<compile_context>
chip_gen: v5e
topology: v5e:2x2
jax: 0.10.0
libtpu: 0.0.40
codegen_flags: <defaults>
</compile_context>

<pallas_src>
import functools

import jax
import jax.numpy as jnp
from jax.experimental import pallas as pl
from jax.experimental.pallas import tpu as pltpu

_SQRT_HALF = 0.7071067811865476  # 1/sqrt(2)


def _round_up(n, m):
    return ((n + m - 1) // m) * m


def _tpu_vmem_capacity_bytes():
    """Physical VMEM per core; conservative 64 MiB (v7x) fallback if unknown."""
    try:
        info = pltpu.get_tpu_info()
        cap = int(getattr(info, "vmem_capacity_bytes", 0))
        if cap > 0:
            return cap
    except Exception:
        pass
    return 64 * 1024 * 1024


def _gelu_f32(h, approximate):
    if approximate:
        # tanh-GELU -> EUP slot (perf option; small numerics change vs torch).
        return jax.nn.gelu(h, approximate=True)
    # Exact erf GELU — matches torch.nn.GELU() default.
    return 0.5 * h * (1.0 + jax.lax.erf(h * _SQRT_HALF))


# ----------------------------------------------------------------------------
# Kernels
# ----------------------------------------------------------------------------
def _ffn_kernel_resident(x_ref, w1_ref, b1_ref, w2_ref, b2_ref, o_ref, *,
                         approx_gelu):
    """Weights fully resident in VMEM; 1-D grid over row tiles; no scratch."""
    x = x_ref[...]                                    # (tm, Dp), input dtype
    cdt = w1_ref.dtype

    # linear1: (tm, Dp) @ (Dp, Fp) -> f32 on the MXU.
    h = jnp.dot(x.astype(cdt), w1_ref[...], preferred_element_type=jnp.float32)
    h = h + b1_ref[...]
    h = _gelu_f32(h, approx_gelu)

    # dropout: identity (eval mode)
    # TODO(synk): training-mode dropout (stochastic masking) not implemented.

    # linear2: (tm, Fp) @ (Fp, Dp) -> f32, bias + residual, single store.
    y = jnp.dot(h.astype(w2_ref.dtype), w2_ref[...],
                preferred_element_type=jnp.float32)
    y = y + b2_ref[...]
    o_ref[...] = (x.astype(jnp.float32) + y).astype(o_ref.dtype)


def _ffn_kernel_tiled_f(x_ref, w1_ref, b1_ref, w2_ref, b2_ref, o_ref, acc_ref,
                        *, approx_gelu):
    """Fallback when weights exceed the VMEM budget: F axis is a reduction."""
    f = pl.program_id(1)

    @pl.when(f == 0)
    def _init():
        acc_ref[...] = jnp.zeros_like(acc_ref)

    x = x_ref[...]
    cdt = w1_ref.dtype

    h = jnp.dot(x.astype(cdt), w1_ref[...], preferred_element_type=jnp.float32)
    h = h + b1_ref[...]
    h = _gelu_f32(h, approx_gelu)

    # dropout: identity (eval mode)
    acc_ref[...] += jnp.dot(h.astype(w2_ref.dtype), w2_ref[...],
                            preferred_element_type=jnp.float32)

    @pl.when(f == pl.num_programs(1) - 1)
    def _finalize():
        y = acc_ref[...] + b2_ref[...]
        o_ref[...] = (x.astype(jnp.float32) + y).astype(o_ref.dtype)


# ----------------------------------------------------------------------------
# Wrappers
# ----------------------------------------------------------------------------
def prepare_ffn_params(w1, b1, w2, b2, *, compute_dtype=jnp.float32,
                       lane_align=128):
    """Pad weights/biases lane-dense and cast ONCE (hoisted out of forward).

    compute_dtype=jnp.float32 gives exact parity with the torch f32 module;
    jnp.bfloat16 is the fast MXU path (precision tradeoff).
    lane_align=256 can be used on v6e/v7x to fill the 256-wide MXU when the
    latent dim is an odd multiple of 128.
    """
    D, F = w1.shape
    Dp = _round_up(D, lane_align)
    Fp = _round_up(F, lane_align)
    w1p = jnp.pad(w1, ((0, Dp - D), (0, Fp - F))).astype(compute_dtype)
    w2p = jnp.pad(w2, ((0, Fp - F), (0, Dp - D))).astype(compute_dtype)
    b1p = jnp.pad(b1, (0, Fp - F)).astype(jnp.float32).reshape(1, Fp)
    b2p = jnp.pad(b2, (0, Dp - D)).astype(jnp.float32).reshape(1, Dp)
    return w1p, b1p, w2p, b2p


@functools.partial(jax.jit, static_argnames=("tile_m", "tile_f", "approx_gelu"))
def ffn_forward(x, w1p, b1p, w2p, b2p, *, tile_m=None, tile_f=None,
                approx_gelu=False):
    """FFN forward: out = x + linear2(dropout(gelu(linear1(x)))).

    x: (B, T, D).  w1p/b1p/w2p/b2p: pre-padded params from prepare_ffn_params.
    tile_m: rows per grid step (auto: 512 clamped to row count).
    tile_f: force the tiled-F reduction path with this F tile (auto: weights
            stay resident in VMEM whenever they fit the per-chip budget).
    """
    B, T, D = x.shape
    Dp, Fp = w1p.shape
    M = B * T

    cdt_bytes = jnp.dtype(w1p.dtype).itemsize
    x_bytes = jnp.dtype(x.dtype).itemsize

    # --- Row tile: big tiles amortize per-step overhead and cut weight
    #     re-streaming; clamp to the (8-aligned) row count for small inputs.
    if tile_m is None:
        tile_m = min(512, max(128, _round_up(M, 8)))
    tile_m = max(8, min(tile_m, _round_up(M, 8)))
    Mp = _round_up(M, tile_m)

    # --- Per-generation VMEM budget with headroom for Mosaic scratch.
    cap = _tpu_vmem_capacity_bytes()
    budget = max(min(cap - 16 * 1024 * 1024, 100 * 1024 * 1024),
                 24 * 1024 * 1024)

    def _resident_bytes(tm):
        io_tiles = 2 * tm * Dp * (2 * x_bytes)        # x + out, double-buffered
        weights = 2 * 2 * Dp * Fp * cdt_bytes         # W1 + W2, 2 buffers each
        biases = 2 * 4 * (Fp + Dp)
        interm = tm * Fp * 4                          # f32 hidden activations
        return io_tiles + weights + biases + interm

    def _tiled_bytes(tm, tf):
        io_tiles = 2 * tm * Dp * (2 * x_bytes)
        weights = 2 * 2 * Dp * tf * cdt_bytes
        biases = 2 * 4 * (tf + Dp)
        acc = tm * Dp * 4
        interm = tm * tf * 4
        return io_tiles + weights + biases + acc + interm

    use_resident = (tile_f is None) and (_resident_bytes(tile_m) <= budget)

    # --- Pad x only when needed (skip extra HBM read/write when aligned).
    x2 = x.reshape(M, D)
    if Mp != M or Dp != D:
        x2 = jnp.pad(x2, ((0, Mp - M), (0, Dp - D)))

    if use_resident:
        vmem_est = _resident_bytes(tile_m)
        kernel = functools.partial(_ffn_kernel_resident,
                                   approx_gelu=approx_gelu)
        out2 = pl.pallas_call(
            kernel,
            out_shape=jax.ShapeDtypeStruct((Mp, Dp), x.dtype),
            grid_spec=pltpu.PrefetchScalarGridSpec(
                num_scalar_prefetch=0,
                grid=(Mp // tile_m,),
                in_specs=[
                    pl.BlockSpec((tile_m, Dp), lambda i: (i, 0)),  # x rows
                    pl.BlockSpec((Dp, Fp), lambda i: (0, 0)),      # W1 resident
                    pl.BlockSpec((1, Fp), lambda i: (0, 0)),       # b1
                    pl.BlockSpec((Fp, Dp), lambda i: (0, 0)),      # W2 resident
                    pl.BlockSpec((1, Dp), lambda i: (0, 0)),       # b2
                ],
                out_specs=pl.BlockSpec((tile_m, Dp), lambda i: (i, 0)),
            ),
            compiler_params=pltpu.CompilerParams(
                dimension_semantics=("parallel",),
                vmem_limit_bytes=int(min(budget,
                                         max(vmem_est * 5 // 4,
                                             32 * 1024 * 1024))),
            ),
        )(x2, w1p, b1p, w2p, b2p)
    else:
        # Pick the largest 128-multiple divisor of Fp that fits the budget
        # (capped by an explicit tile_f request).
        tf_cap = Fp if tile_f is None else max(128, min(tile_f, Fp))
        tf = 128
        for k in range(Fp // 128, 0, -1):
            cand = k * 128
            if cand <= tf_cap and Fp % cand == 0 and \
                    _tiled_bytes(tile_m, cand) <= budget:
                tf = cand
                break
        vmem_est = _tiled_bytes(tile_m, tf)
        kernel = functools.partial(_ffn_kernel_tiled_f,
                                   approx_gelu=approx_gelu)
        out2 = pl.pallas_call(
            kernel,
            out_shape=jax.ShapeDtypeStruct((Mp, Dp), x.dtype),
            grid_spec=pltpu.PrefetchScalarGridSpec(
                num_scalar_prefetch=0,
                grid=(Mp // tile_m, Fp // tf),
                in_specs=[
                    pl.BlockSpec((tile_m, Dp), lambda i, f: (i, 0)),  # x rows
                    pl.BlockSpec((Dp, tf), lambda i, f: (0, f)),      # W1 tile
                    pl.BlockSpec((1, tf), lambda i, f: (0, f)),       # b1 tile
                    pl.BlockSpec((tf, Dp), lambda i, f: (f, 0)),      # W2 tile
                    pl.BlockSpec((1, Dp), lambda i, f: (0, 0)),       # b2
                ],
                out_specs=pl.BlockSpec((tile_m, Dp), lambda i, f: (i, 0)),
                scratch_shapes=[pltpu.VMEM((tile_m, Dp), jnp.float32)],
            ),
            compiler_params=pltpu.CompilerParams(
                dimension_semantics=("parallel", "arbitrary"),
                vmem_limit_bytes=int(min(budget,
                                         max(vmem_est * 5 // 4,
                                             32 * 1024 * 1024))),
            ),
        )(x2, w1p, b1p, w2p, b2p)

    if Mp != M or Dp != D:
        out2 = out2[:M, :D]
    return out2.reshape(B, T, D)


def init_ffn_params(key, latent_dim, ffn_dim, dtype=jnp.float32):
    """Parameter init mirroring the module: linear2 is zero_module'd."""
    k_w1, k_b1 = jax.random.split(key)
    w1 = (jax.random.normal(k_w1, (latent_dim, ffn_dim), dtype)
          * (1.0 / jnp.sqrt(latent_dim)).astype(dtype))
    b1 = jax.random.normal(k_b1, (ffn_dim,), dtype) * 0.01
    w2 = jnp.zeros((ffn_dim, latent_dim), dtype)   # zero_module
    b2 = jnp.zeros((latent_dim,), dtype)           # zero_module
    return w1, b1, w2, b2


def _reference_ffn(x, w1, b1, w2, b2):
    h = jnp.dot(x, w1) + b1
    h = jax.nn.gelu(h, approximate=False)
    y = jnp.dot(h, w2) + b2
    return x + y


if __name__ == "__main__":
    B, T, D, F = 2, 8, 32, 64  # batch, seq, latent_dim, ffn_dim

    key = jax.random.PRNGKey(0)
    k_x, k_p, k_w2, k_b2 = jax.random.split(key, 4)
    x = jax.random.normal(k_x, (B, T, D), jnp.float32)
    w1, b1, w2, b2 = init_ffn_params(k_p, D, F)

    # (1) Module-faithful params (zero-initialized linear2), f32 parity path,
    #     weight-resident kernel (default).
    params = prepare_ffn_params(w1, b1, w2, b2)  # compute_dtype=f32 default
    out = jax.block_until_ready(ffn_forward(x, *params))
    ref = _reference_ffn(x, w1, b1, w2, b2)
    assert out.shape == (B, T, D)
    assert jnp.allclose(out, ref, atol=1e-5, rtol=1e-5), "mismatch (zero linear2)"

    # (2) Full compute path with nonzero linear2, f32, resident path.
    w2_nz = jax.random.normal(k_w2, (F, D), jnp.float32) * 0.05
    b2_nz = jax.random.normal(k_b2, (D,), jnp.float32) * 0.01
    params_nz = prepare_ffn_params(w1, b1, w2_nz, b2_nz)
    out2 = jax.block_until_ready(ffn_forward(x, *params_nz))
    ref2 = _reference_ffn(x, w1, b1, w2_nz, b2_nz)
    assert jnp.allclose(out2, ref2, atol=1e-5, rtol=1e-5), "mismatch (resident)"

    # (3) Exercise the tiled-F fallback explicitly (same math, accumulator path).
    out3 = jax.block_until_ready(ffn_forward(x, *params_nz, tile_f=128))
    assert jnp.allclose(out3, ref2, atol=1e-5, rtol=1e-5), "mismatch (tiled-F)"

    # (4) bf16 MXU perf path (documented precision tradeoff) — loose tolerance.
    params_bf16 = prepare_ffn_params(w1, b1, w2_nz, b2_nz,
                                     compute_dtype=jnp.bfloat16)
    out4 = jax.block_until_ready(ffn_forward(x, *params_bf16))
    assert jnp.allclose(out4, ref2, atol=3e-2, rtol=3e-2), "mismatch (bf16)"

    print("KERNEL_OK")
</pallas_src>

<mosaic_0001>
module attributes {stable_mosaic.version = 11 : i64} {
  func.func @_ffn_kernel_resident(%arg0: i32, %arg1: memref<16x128xf32, #tpu.memory_space<vmem>>, %arg2: memref<128x128xf32, #tpu.memory_space<vmem>>, %arg3: memref<1x128xf32, #tpu.memory_space<vmem>>, %arg4: memref<128x128xf32, #tpu.memory_space<vmem>>, %arg5: memref<1x128xf32, #tpu.memory_space<vmem>>, %arg6: memref<16x128xf32, #tpu.memory_space<vmem>>) attributes {dimension_semantics = [#tpu.dimension_semantics<parallel>], iteration_bounds = array<i64: 1>, scalar_prefetch = 0 : i64, scratch_operands = 0 : i64, tpu.core_type = #tpu.core_type<tc>, window_params = [{transform_indices = @transform_0, window_bounds = array<i64: 16, 128>}, {pipeline_mode = #tpu.pipeline_mode<synchronous>, transform_indices = @transform_1, window_bounds = array<i64: 128, 128>}, {pipeline_mode = #tpu.pipeline_mode<synchronous>, transform_indices = @transform_2, window_bounds = array<i64: 1, 128>}, {pipeline_mode = #tpu.pipeline_mode<synchronous>, transform_indices = @transform_3, window_bounds = array<i64: 128, 128>}, {pipeline_mode = #tpu.pipeline_mode<synchronous>, transform_indices = @transform_4, window_bounds = array<i64: 1, 128>}, {transform_indices = @transform_5, window_bounds = array<i64: 16, 128>}]} {
    %c0 = arith.constant 0 : index
    %c0_0 = arith.constant 0 : index
    %0 = vector.load %arg1[%c0, %c0_0] : memref<16x128xf32, #tpu.memory_space<vmem>>, vector<16x128xf32>
    %c0_1 = arith.constant 0 : index
    %c0_2 = arith.constant 0 : index
    %1 = vector.load %arg2[%c0_1, %c0_2] : memref<128x128xf32, #tpu.memory_space<vmem>>, vector<128x128xf32>
    %cst = arith.constant dense<0.000000e+00> : vector<16x128xf32>
    %2 = tpu.matmul %0, %1, %cst {dimension_numbers = #tpu.dot_dimension_numbers<[1], [0], [0], [1], [0, 0, 1, 1], [], []>} : vector<16x128xf32>, vector<128x128xf32>, vector<16x128xf32> -> vector<16x128xf32>
    %c0_3 = arith.constant 0 : index
    %c0_4 = arith.constant 0 : index
    %3 = vector.load %arg3[%c0_3, %c0_4] : memref<1x128xf32, #tpu.memory_space<vmem>>, vector<1x128xf32>
    %4 = vector.broadcast %3 : vector<1x128xf32> to vector<16x128xf32>
    %5 = arith.addf %2, %4 : vector<16x128xf32>
    %cst_5 = arith.constant 5.000000e-01 : f32
    %6 = vector.broadcast %cst_5 : f32 to vector<16x128xf32>
    %7 = arith.mulf %6, %5 : vector<16x128xf32>
    %cst_6 = arith.constant 0.707106769 : f32
    %8 = vector.broadcast %cst_6 : f32 to vector<16x128xf32>
    %9 = arith.mulf %5, %8 : vector<16x128xf32>
    %10 = math.erf %9 : vector<16x128xf32>
    %cst_7 = arith.constant 1.000000e+00 : f32
    %11 = vector.broadcast %cst_7 : f32 to vector<16x128xf32>
    %12 = arith.addf %11, %10 : vector<16x128xf32>
    %13 = arith.mulf %7, %12 : vector<16x128xf32>
    %c0_8 = arith.constant 0 : index
    %c0_9 = arith.constant 0 : index
    %14 = vector.load %arg4[%c0_8, %c0_9] : memref<128x128xf32, #tpu.memory_space<vmem>>, vector<128x128xf32>
    %cst_10 = arith.constant dense<0.000000e+00> : vector<16x128xf32>
    %15 = tpu.matmul %13, %14, %cst_10 {dimension_numbers = #tpu.dot_dimension_numbers<[1], [0], [0], [1], [0, 0, 1, 1], [], []>} : vector<16x128xf32>, vector<128x128xf32>, vector<16x128xf32> -> vector<16x128xf32>
    %c0_11 = arith.constant 0 : index
    %c0_12 = arith.constant 0 : index
    %16 = vector.load %arg5[%c0_11, %c0_12] : memref<1x128xf32, #tpu.memory_space<vmem>>, vector<1x128xf32>
    %17 = vector.broadcast %16 : vector<1x128xf32> to vector<16x128xf32>
    %18 = arith.addf %15, %17 : vector<16x128xf32>
    %19 = arith.addf %0, %18 : vector<16x128xf32>
    %c0_13 = arith.constant 0 : index
    %c0_14 = arith.constant 0 : index
    %20 = vector.load %arg6[%c0_13, %c0_14] : memref<16x128xf32, #tpu.memory_space<vmem>>, vector<16x128xf32>
    tpu.vector_store %arg6[%c0_13, %c0_14], %19 {strides = array<i32>} : memref<16x128xf32, #tpu.memory_space<vmem>>, vector<16x128xf32>,
    return
  }
  func.func @transform_0(%arg0: i32) -> (i32, i32) {
    %c0_i32 = arith.constant 0 : i32
    %c0_i32_0 = arith.constant 0 : i32
    return %arg0, %c0_i32 : i32, i32
  }
  func.func @transform_1(%arg0: i32) -> (i32, i32) {
    %c0_i32 = arith.constant 0 : i32
    %c0_i32_0 = arith.constant 0 : i32
    %c0_i32_1 = arith.constant 0 : i32
    return %c0_i32, %c0_i32_0 : i32, i32
  }
  func.func @transform_2(%arg0: i32) -> (i32, i32) {
    %c0_i32 = arith.constant 0 : i32
    %c0_i32_0 = arith.constant 0 : i32
    %c0_i32_1 = arith.constant 0 : i32
    return %c0_i32, %c0_i32_0 : i32, i32
  }
  func.func @transform_3(%arg0: i32) -> (i32, i32) {
    %c0_i32 = arith.constant 0 : i32
    %c0_i32_0 = arith.constant 0 : i32
    %c0_i32_1 = arith.constant 0 : i32
    return %c0_i32, %c0_i32_0 : i32, i32
  }
  func.func @transform_4(%arg0: i32) -> (i32, i32) {
    %c0_i32 = arith.constant 0 : i32
    %c0_i32_0 = arith.constant 0 : i32
    %c0_i32_1 = arith.constant 0 : i32
    return %c0_i32, %c0_i32_0 : i32, i32
  }
  func.func @transform_5(%arg0: i32) -> (i32, i32) {
    %c0_i32 = arith.constant 0 : i32
    %c0_i32_0 = arith.constant 0 : i32
    return %arg0, %c0_i32 : i32, i32
  }
}

</mosaic_0001>

<bundles_post_ra>
// kernel: ffn_forward.1
= control target key start
LH: loop header
LB: loop body
LE: loop exit
PB: predicated region body
PF: predicated region fallthrough
CT: control target
= control target key end

     0   :  { %10 = vsyncpa [#allocation3], 0  ;;  %s430_s0 = inlined_call_operand.vmem [shape: f32[16,128], index: 0, kind: input, shape index: {}]   ;;  %s431_s1 = inlined_call_operand.hbm [shape: f32[128,128], index: 1, kind: input, shape index: {}]   ;;  %s432_s2 = inlined_call_operand.vmem [shape: f32[1,128], index: 2, kind: input, shape index: {}]   ;;  %s433_s3 = inlined_call_operand.hbm [shape: f32[128,128], index: 3, kind: input, shape index: {}]   ;;  %s434_s4 = inlined_call_operand.vmem [shape: f32[1,128], index: 4, kind: input, shape index: {}]   ;;  %s435_s5 = inlined_call_operand.vmem [shape: f32[16,128], index: 5, kind: output, shape index: {}]  }
   0x1   :  { %s18_s20 = sshll.u32 %s431_s1, 4  ;;  %s19_s20 = int_to_ptr.hbm [resolvable:$true] %s18_s20 }
   0x2   :  { %11 = vsyncpa [#allocation5], 0  ;;  %s334_s21 = smov [#allocation2]   ;;  %s33_s25 = sshll.u32 %s433_s3, 4  ;;  %s34_s25 = int_to_ptr.hbm [resolvable:$true] %s33_s25 }
   0x3   :  { %s20_s22 = sshll.u32 %s334_s21, 4  ;;  %s335_s26 = smov 128   ;;  %s21_s22 = int_to_ptr.vmem [resolvable:$true] %s20_s22 }
   0x4   :  { %s336_s27 = smov 8   ;;  %s337_s28 = smov [#allocation4]  }
   0x5   :  { %26 = dma.hbm_to_vmem [thread:$0]  %s19_s20, 2048, %s21_s22, [#allocation3], %s335_s26, %s335_s26, %s336_s27  }
   0x6   :  { %s35_s29 = sshll.u32 %s337_s28, 4  ;;  %s36_s29 = int_to_ptr.vmem [resolvable:$true] %s35_s29 }
   0x7   :  { %41 = dma.hbm_to_vmem [thread:$0]  %s34_s25, 2048, %s36_s29, [#allocation5], %s335_s26, %s335_s26, %s336_s27  }
   0x8   :  { %330 = dma.done.wait [#allocation3], 2048  }
   0x9   :  { %331 = vsyncadd [#allocation3], 4294965248 }
   0xa   :  { %332 = dma.done.wait [#allocation5], 2048  }
   0xb   :  { %333 = vsyncadd [#allocation5], 4294965248  ;;  %v69_v0 = vld [vmem:[#allocation2 + $0x78] sm:$0xff]  ;;  %v68_v1 = vld [vmem:[#allocation2 + $0x70] sm:$0xff] }
   0xc   :  { %74 = vmatpush.msra.mxu0 %v69_v0  ;;  %240 = vmatpush.msra.mxu2 %v69_v0  ;;  %v67_v2 = vld [vmem:[#allocation2 + $0x68] sm:$0xff]  ;;  %v66_v3 = vld [vmem:[#allocation2 + $0x60] sm:$0xff]  ;;  %v65_v4 = vld [vmem:[#allocation2 + $0x58] sm:$0xff] }
   0xd   :  { %v64_v5 = vld [vmem:[#allocation2 + $0x50] sm:$0xff]  ;;  %v63_v6 = vld [vmem:[#allocation2 + $0x48] sm:$0xff]  ;;  %v62_v7 = vld [vmem:[#allocation2 + $0x40] sm:$0xff] }
   0xe   :  { %75 = vmatpush.msra.mxu0 %v68_v1  ;;  %241 = vmatpush.msra.mxu2 %v68_v1  ;;  %v61_v8 = vld [vmem:[#allocation2 + $0x38] sm:$0xff]  ;;  %v60_v9 = vld [vmem:[#allocation2 + $0x30] sm:$0xff]  ;;  %v59_v10 = vld [vmem:[#allocation2 + $0x28] sm:$0xff] }
   0xf   :  { %v58_v11 = vld [vmem:[#allocation2 + $0x20] sm:$0xff]  ;;  %v57_v12 = vld [vmem:[#allocation2 + $0x18] sm:$0xff]  ;;  %v56_v13 = vld [vmem:[#allocation2 + $0x10] sm:$0xff] }
  0x10   :  { %76 = vmatpush.msra.mxu0 %v67_v2  ;;  %242 = vmatpush.msra.mxu2 %v67_v2  ;;  %v55_v14 = vld [vmem:[#allocation2 + $0x8] sm:$0xff]  ;;  %v54_v15 = vld [vmem:[#allocation2] sm:$0xff]  ;;  %v200_v18 = vld [vmem:[#allocation4 + $0x78] sm:$0xff] }
  0x11   :  { %v377_v16 = vld [vmem:[%s430_s0] sm:$0xff]  ;;  %v382_v17 = vld [vmem:[%s430_s0 + $0x8] sm:$0xff]  ;;  %205 = vmatpush.msra.mxu1 %v200_v18  ;;  %256 = vmatpush.msra.mxu3 %v200_v18  ;;  %v199_v19 = vld [vmem:[#allocation4 + $0x70] sm:$0xff] }
  0x12   :  { %77 = vmatpush.msra.mxu0 %v66_v3  ;;  %243 = vmatpush.msra.mxu2 %v66_v3  ;;  %v198_v20 = vld [vmem:[#allocation4 + $0x68] sm:$0xff]  ;;  %v197_v21 = vld [vmem:[#allocation4 + $0x60] sm:$0xff]  ;;  %v196_v23 = vld [vmem:[#allocation4 + $0x58] sm:$0xff] }
  0x13   :  { %206 = vmatpush.msra.mxu1 %v199_v19  ;;  %257 = vmatpush.msra.mxu3 %v199_v19  ;;  %v276_v22 = vld [vmem:[%s432_s2] ss:$0 sm:$0xff]  ;;  %v195_v25 = vld [vmem:[#allocation4 + $0x50] sm:$0xff]  ;;  %v194_v27 = vld [vmem:[#allocation4 + $0x48] sm:$0xff] }
  0x14   :  { %78 = vmatpush.msra.mxu0 %v65_v4  ;;  %244 = vmatpush.msra.mxu2 %v65_v4  ;;  %v193_v29 = vld [vmem:[#allocation4 + $0x40] sm:$0xff]  ;;  %v192_v30 = vld [vmem:[#allocation4 + $0x38] sm:$0xff]  ;;  %v191_v33 = vld [vmem:[#allocation4 + $0x30] sm:$0xff] }
  0x15   :  { %207 = vmatpush.msra.mxu1 %v198_v20  ;;  %258 = vmatpush.msra.mxu3 %v198_v20  ;;  %v190_v36 = vld [vmem:[#allocation4 + $0x28] sm:$0xff]  ;;  %v189_v39 = vld [vmem:[#allocation4 + $0x20] sm:$0xff]  ;;  %v188_v43 = vld [vmem:[#allocation4 + $0x18] sm:$0xff] }
  0x16   :  { %79 = vmatpush.msra.mxu0 %v64_v5  ;;  %245 = vmatpush.msra.mxu2 %v64_v5  ;;  %v187_v47 = vld [vmem:[#allocation4 + $0x10] sm:$0xff]  ;;  %v186_v52 = vld [vmem:[#allocation4 + $0x8] sm:$0xff]  ;;  %v185_v56 = vld [vmem:[#allocation4] sm:$0xff] }
  0x17   :  { %208 = vmatpush.msra.mxu1 %v197_v21  ;;  %259 = vmatpush.msra.mxu3 %v197_v21 }
  0x18   :  { %80 = vmatpush.msra.mxu0 %v63_v6  ;;  %246 = vmatpush.msra.mxu2 %v63_v6 }
  0x19   :  { %209 = vmatpush.msra.mxu1 %v196_v23  ;;  %260 = vmatpush.msra.mxu3 %v196_v23 }
  0x1a   :  { %81 = vmatpush.msra.mxu0 %v62_v7  ;;  %247 = vmatpush.msra.mxu2 %v62_v7 }
  0x1b   :  { %210 = vmatpush.msra.mxu1 %v195_v25  ;;  %261 = vmatpush.msra.mxu3 %v195_v25 }
  0x1c   :  { %82 = vmatpush.msra.mxu0 %v61_v8  ;;  %248 = vmatpush.msra.mxu2 %v61_v8 }
  0x1d   :  { %211 = vmatpush.msra.mxu1 %v194_v27  ;;  %262 = vmatpush.msra.mxu3 %v194_v27 }
  0x1e   :  { %83 = vmatpush.msra.mxu0 %v60_v9  ;;  %249 = vmatpush.msra.mxu2 %v60_v9 }
  0x1f   :  { %212 = vmatpush.msra.mxu1 %v193_v29  ;;  %263 = vmatpush.msra.mxu3 %v193_v29 }
  0x20   :  { %84 = vmatpush.msra.mxu0 %v59_v10  ;;  %250 = vmatpush.msra.mxu2 %v59_v10 }
  0x21   :  { %213 = vmatpush.msra.mxu1 %v192_v30  ;;  %264 = vmatpush.msra.mxu3 %v192_v30 }
  0x22   :  { %85 = vmatpush.msra.mxu0 %v58_v11  ;;  %251 = vmatpush.msra.mxu2 %v58_v11 }
  0x23   :  { %214 = vmatpush.msra.mxu1 %v191_v33  ;;  %265 = vmatpush.msra.mxu3 %v191_v33 }
  0x24   :  { %86 = vmatpush.msra.mxu0 %v57_v12  ;;  %252 = vmatpush.msra.mxu2 %v57_v12 }
  0x25   :  { %215 = vmatpush.msra.mxu1 %v190_v36  ;;  %266 = vmatpush.msra.mxu3 %v190_v36 }
  0x26   :  { %87 = vmatpush.msra.mxu0 %v56_v13  ;;  %253 = vmatpush.msra.mxu2 %v56_v13 }
  0x27   :  { %216 = vmatpush.msra.mxu1 %v189_v39  ;;  %267 = vmatpush.msra.mxu3 %v189_v39 }
  0x28   :  { %88 = vmatpush.msra.mxu0 %v55_v14  ;;  %254 = vmatpush.msra.mxu2 %v55_v14 }
  0x29   :  { %217 = vmatpush.msra.mxu1 %v188_v43  ;;  %268 = vmatpush.msra.mxu3 %v188_v43 }
  0x2a   :  { %89 = vmatpush.msra.mxu0 %v54_v15  ;;  %255 = vmatpush.msra.mxu2 %v54_v15 }
  0x2b   :  { %90 = vmatmul.f32.vlgmr.msra.gmra.mxu0 %v377_v16  ;;  %93 = vmatmul.f32.vlgmr.msra.gmra.mxu2 %v382_v17 }
  0x2c   :  { %218 = vmatpush.msra.mxu1 %v187_v47  ;;  %269 = vmatpush.msra.mxu3 %v187_v47 }
  0x2e   :  { %219 = vmatpush.msra.mxu1 %v186_v52  ;;  %270 = vmatpush.msra.mxu3 %v186_v52 }
  0x30   :  { %220 = vmatpush.msra.mxu1 %v185_v56  ;;  %271 = vmatpush.msra.mxu3 %v185_v56 }
  0xa8   :  { %v91_v24 = vpop.f32.mrf.mxu0 }
  0xa9   :  { %v389_v26 = vadd.f32 %v276_v22, %v91_v24 }
  0xab   :  { %v392_v28 = vmul.f32 0.70710677, %v389_v26 }
  0xad   :  { %v101_v31 = vmul.f32 %v392_v28, %v392_v28 }
  0xae   :  { %v94_v32 = vpop.f32.mrf.mxu2 }
  0xaf   :  { %v396_v34 = vmin.f32 %v101_v31, 16.0  ;;  %v398_v35 = vadd.f32 %v276_v22, %v94_v32 }
  0xb1   :  { %v103_v37 = vmul.f32 2.1237322e-06, %v396_v34  ;;  %v402_v38 = vmul.f32 0.70710677, %v398_v35  ;;  %v114_v40 = vmul.f32 3.8918573e-05, %v396_v34 }
  0xb3   :  { %v104_v41 = vadd.f32 0.00028619796, %v103_v37  ;;  %v141_v42 = vmul.f32 %v402_v38, %v402_v38  ;;  %v115_v44 = vadd.f32 0.001143296, %v114_v40 }
  0xb5   :  { %v105_v45 = vmul.f32 %v104_v41, %v396_v34  ;;  %v142_v46 = vmin.f32 %v141_v42, 16.0  ;;  %v116_v48 = vmul.f32 %v115_v44, %v396_v34 }
  0xb7   :  { %v143_v49 = vmul.f32 2.1237322e-06, %v142_v46  ;;  %v154_v50 = vmul.f32 3.8918573e-05, %v142_v46  ;;  %v106_v51 = vadd.f32 0.0036580483, %v105_v45 }
  0xb8   :  { %v117_v53 = vadd.f32 0.014752088, %v116_v48 }
  0xb9   :  { %v144_v54 = vadd.f32 0.00028619796, %v143_v49  ;;  %v155_v55 = vadd.f32 0.001143296, %v154_v50  ;;  %v107_v60 = vmul.f32 %v106_v51, %v396_v34  ;;  %v97_v49 = vmul.f32 0.5, %v389_v26 }
  0xba   :  { %v118_v57 = vmul.f32 %v117_v53, %v396_v34 }
  0xbb   :  { %v145_v58 = vmul.f32 %v144_v54, %v142_v46  ;;  %v156_v59 = vmul.f32 %v155_v55, %v142_v46  ;;  %v108_v2 = vadd.f32 0.05243302, %v107_v60  ;;  %v98_v55 = vmul.f32 0.5, %v398_v35 }
  0xbc   :  { %v119_v61 = vadd.f32 0.112945676, %v118_v57 }
  0xbd   :  { %v146_v62 = vadd.f32 0.0036580483, %v145_v58  ;;  %v157_v63 = vadd.f32 0.014752088, %v156_v59  ;;  %v109_v8 = vmul.f32 %v108_v2, %v396_v34  ;;  %v277_v58 = vld [vmem:[%s434_s4] ss:$0 sm:$0xff] }
  0xbe   :  { %v120_v0 = vmul.f32 %v119_v61, %v396_v34 }
  0xbf   :  { %v158_v1 = vmul.f32 %v157_v63, %v142_v46  ;;  %v147_v4 = vmul.f32 %v146_v62, %v142_v46  ;;  %v110_v13 = vadd.f32 0.18741608, %v109_v8 }
  0xc0   :  { %v121_v3 = vadd.f32 0.4994258, %v120_v0 }
  0xc1   :  { %v159_v5 = vadd.f32 0.112945676, %v158_v1  ;;  %v148_v10 = vadd.f32 0.05243302, %v147_v4  ;;  %v111_v19 = vmul.f32 %v110_v13, %v396_v34 }
  0xc2   :  { %v122_v6 = vmul.f32 %v121_v3, %v396_v34 }
  0xc3   :  { %v160_v7 = vmul.f32 %v159_v5, %v142_v46  ;;  %v149_v14 = vmul.f32 %v148_v10, %v142_v46  ;;  %v112_v23 = vadd.f32 1.1283791, %v111_v19 }
  0xc4   :  { %v123_v9 = vadd.f32 1.0, %v122_v6 }
  0xc5   :  { %v161_v11 = vadd.f32 0.4994258, %v160_v7  ;;  %v150_v20 = vadd.f32 0.18741608, %v149_v14  ;;  %v113_v33 = vmul.f32 %v112_v23, %v392_v28 }
  0xc6   :  { %278 = vrcp.f32 %v123_v9  ;;  %v135_v24 = vand.u32 2147483648, %v123_v9  ;;  %v133_v30 = vand.u32 2147483647, %v123_v9  ;;  %vm129_vm1 = vweird.f32 %v123_v9 }
  0xc7   :  { %v162_v12 = vmul.f32 %v161_v11, %v142_v46  ;;  %v151_v27 = vmul.f32 %v150_v20, %v142_v46 }
  0xc8   :  { %v136_v36 = vor.u32 1.1754944e-38, %v135_v24  ;;  %vm134_vm3 = vcmp.eq.f32.partialorder %v133_v30, 8.507059e+37 }
  0xc9   :  { %v163_v15 = vadd.f32 1.0, %v162_v12  ;;  %v152_v39 = vadd.f32 1.1283791, %v151_v27 }
  0xcb   :  { %280 = vrcp.f32 %v163_v15  ;;  %v175_v40 = vand.u32 2147483648, %v163_v15  ;;  %v173_v43 = vand.u32 2147483647, %v163_v15  ;;  %vm169_vm5 = vweird.f32 %v163_v15 }
  0xcc   :  { %v279_v18 = vpop.eup %278  ;;  %v153_v48 = vmul.f32 %v152_v39, %v402_v38 }
  0xcd   :  { %v125_v21 = vmul.f32 %v279_v18, %v123_v9  ;;  %vm130_vm0 = vweird.f32 %v279_v18  ;;  %v176_v47 = vor.u32 1.1754944e-38, %v175_v40  ;;  %vm174_vm7 = vcmp.eq.f32.partialorder %v173_v43, 8.507059e+37 }
  0xce   :  { %vm131_vm2 = vmor %vm129_vm1, %vm130_vm0 }
  0xcf   :  { %v126_v22 = vsub.f32 1.0, %v125_v21 }
  0xd1   :  { %v281_v25 = vpop.eup %280  ;;  %v127_v29 = vmul.f32 %v279_v18, %v126_v22 }
  0xd2   :  { %v165_v31 = vmul.f32 %v281_v25, %v163_v15  ;;  %vm170_vm4 = vweird.f32 %v281_v25 }
  0xd3   :  { %v128_v32 = vadd.f32 %v279_v18, %v127_v29  ;;  %vm171_vm6 = vmor %vm169_vm5, %vm170_vm4 }
  0xd4   :  { %v166_v37 = vsub.f32 1.0, %v165_v31 }
  0xd5   :  { %v132_v34 = vsel %vm131_vm2, %v279_v18, %v128_v32 }
  0xd6   :  { %v137_v41 = vsel %vm134_vm3, %v136_v36, %v132_v34  ;;  %v167_v42 = vmul.f32 %v281_v25, %v166_v37 }
  0xd7   :  { %v138_v44 = vmul.f32 %v137_v41, %v113_v33 }
  0xd8   :  { %v168_v45 = vadd.f32 %v281_v25, %v167_v42 }
  0xd9   :  { %v238_v46 = vclamps-f32 %v138_v44, 1.0 }
  0xda   :  { %v172_v28 = vsel %vm171_vm6, %v281_v25, %v168_v45 }
  0xdb   :  { %v181_v50 = vadd.f32 1.0, %v238_v46  ;;  %v177_v51 = vsel %vm174_vm7, %v176_v47, %v172_v28 }
  0xdc   :  { %v178_v52 = vmul.f32 %v177_v51, %v153_v48 }
  0xdd   :  { %v183_v53 = vmul.f32 %v181_v50, %v97_v49 }
  0xde   :  { %v239_v54 = vclamps-f32 %v178_v52, 1.0 }
  0xdf   :  { %221 = vmatmul.f32.vlgmr.msra.gmra.mxu1 %v183_v53 }
  0xe0   :  { %v182_v56 = vadd.f32 1.0, %v239_v54 }
  0xe2   :  { %v184_v57 = vmul.f32 %v182_v56, %v98_v55 }
  0xe4   :  { %224 = vmatmul.f32.vlgmr.msra.gmra.mxu3 %v184_v57 }
 0x15c   :  { %v222_v38 = vpop.f32.mrf.mxu1 }
 0x15d   :  { %v223_v59 = vadd.f32 %v277_v58, %v222_v38 }
 0x15f   :  { %v228_v60 = vadd.f32 %v223_v59, %v377_v16 }
 0x161   :  { %230 = vst [vmem:[%s435_s5] sm:$0xff] %v228_v60 }
 0x167   :  { %v225_v26 = vpop.f32.mrf.mxu3 }
 0x168   :  { %v226_v61 = vadd.f32 %v277_v58, %v225_v26 }
 0x16a   :  { %v229_v62 = vadd.f32 %v226_v61, %v382_v17 }
 0x16c   :  { %231 = vst [vmem:[%s435_s5 + $0x8] sm:$0xff] %v229_v62 }
 0x16d   :  { %236 = vsyncpa [#allocation3], 1 }
 0x16e   :  { %237 = vsyncpa [#allocation5], 1 }

</bundles_post_ra>
